<compile_context>
chip_gen: v7x
topology: tpu7x:2x2x1
jax: 0.10.0
libtpu: 0.0.40
codegen_flags: <defaults>
</compile_context>

<pallas_src>
import math

import jax
import jax.numpy as jnp
from jax.experimental import pallas as pl
from jax.experimental.pallas import tpu as pltpu

NEG_SLOPE = 0.01  # F.leaky_relu default negative slope

# Layer sizes (in, out) of ImprovedModel's forward path.
SIZES = [(15, 36), (36, 8), (8, 16), (16, 4), (4, 8), (8, 1)]
_LANES = 128


def _round_up(n, m):
    return (n + m - 1) // m * m


# ---- packed-slab layout (all row offsets 8-aligned) -------------------------
# Weights stored transposed: W^T (out_pad, in) occupies the first `in` lanes
# of an (out_pad, 128) row block; biases are column 0 of their own row block.
_OUT_PAD = tuple(_round_up(o, 8) for _, o in SIZES)       # (40, 8, 16, 8, 8, 8)
# Lane width of the weight slice used by layer l: layer 0 contracts the raw 15
# x features; layers 1..5 contract the previous layer's padded output rows.
_IN_SLICE = (SIZES[0][0],) + _OUT_PAD[:-1]                # (15, 40, 8, 16, 8, 8)

_W_OFF = []
_B_OFF = []
_off = 0
for _op in _OUT_PAD:
    _W_OFF.append(_off)
    _off += _op
for _op in _OUT_PAD:
    _B_OFF.append(_off)
    _off += _op
_SLAB_ROWS = _round_up(_off, 8)                           # 176 rows -> 88 KiB


def _leaky_relu(x):
    return jnp.where(x > 0, x, NEG_SLOPE * x)


def pack_params(params):
    """Pack [(W(in,out), b(1,out)) x 6] into one (176, 128) f32 slab."""
    slab = jnp.zeros((_SLAB_ROWS, _LANES), jnp.float32)
    for l, (w, b) in enumerate(params):
        fan_in, fan_out = w.shape
        wt = jnp.asarray(w, jnp.float32).T                     # (out, in)
        bv = jnp.reshape(jnp.asarray(b, jnp.float32), (-1,))   # (out,)
        slab = slab.at[_W_OFF[l]:_W_OFF[l] + fan_out, :fan_in].set(wt)
        slab = slab.at[_B_OFF[l]:_B_OFF[l] + fan_out, 0].set(bv)
    return slab


def mlp_kernel(x_ref, w_ref, o_ref):
    # x_ref: (TB, 15) streamed batch tile (batch rows, raw features)
    # w_ref: (176, 128) resident packed parameters
    # o_ref: (1, TB)   lane-dense output tile
    #
    # Activations are kept transposed as (out_pad, TB).  Zero-padded output
    # rows stay exactly 0 through every layer (zero weight rows + zero bias,
    # leaky_relu(0) = 0), so they never contaminate the next contraction.

    # Layer 0: contract the 15 feature lanes of x against W1^T's 15 lanes.
    wt0 = w_ref[_W_OFF[0]:_W_OFF[0] + _OUT_PAD[0], 0:_IN_SLICE[0]]    # (40, 15)
    b0 = w_ref[_B_OFF[0]:_B_OFF[0] + _OUT_PAD[0], 0:1]                # (40, 1)
    h = jax.lax.dot_general(wt0, x_ref[...], (((1,), (1,)), ((), ())),
                            preferred_element_type=jnp.float32) + b0  # (40, TB)
    h = _leaky_relu(h)

    # Layers 1..4: h <- leaky_relu(W^T @ h + b), all (out_pad, TB).
    for l in range(1, 5):
        wt = w_ref[_W_OFF[l]:_W_OFF[l] + _OUT_PAD[l], 0:_IN_SLICE[l]]
        b = w_ref[_B_OFF[l]:_B_OFF[l] + _OUT_PAD[l], 0:1]
        h = _leaky_relu(jnp.dot(wt, h, preferred_element_type=jnp.float32) + b)

    # Layer 5 (8 -> 1, no activation): only row 0 of the (8, TB) result is
    # valid; store it as a lane-dense (1, TB) row.
    wt5 = w_ref[_W_OFF[5]:_W_OFF[5] + _OUT_PAD[5], 0:_IN_SLICE[5]]    # (8, 8)
    b5 = w_ref[_B_OFF[5]:_B_OFF[5] + 1, 0:1]                          # (1, 1)
    y = jnp.dot(wt5, h, preferred_element_type=jnp.float32)           # (8, TB)
    o_ref[...] = (y[0:1, :] + b5).astype(o_ref.dtype)


def improved_model_forward(x, slab, tb=2048):
    """x: (B, 15) float32, slab: pack_params(...) -> (B, 1) float32."""
    B, F = x.shape
    assert F == SIZES[0][0], F
    # Batch tile: multiple of 256 so the batch/lane dim fully tiles the
    # 256-wide MXU on v6e/v7x, and large (default 2048) to amortize the
    # ~0.35us per-grid-step overhead.  VMEM stays tiny (<~3 MiB at TB=2048).
    TB = min(tb, _round_up(B, 256))
    # v7x has 2 TensorCores and the batch axis is "parallel": if the whole
    # batch would collapse to a single tile, split it so both TCs get work.
    if TB >= 512 and pl.cdiv(B, TB) == 1:
        TB = _round_up(TB // 2, 256)
    num_tiles = pl.cdiv(B, TB)

    # No host-side padding / copy of x: the feature block is the full 15
    # lanes (full-extent last dim is allowed) and the ragged last row-tile is
    # handled by Pallas' bounded loads and masked output stores; garbage tail
    # rows only affect output lanes >= B, which do not exist in (1, B).
    out = pl.pallas_call(
        mlp_kernel,
        out_shape=jax.ShapeDtypeStruct((1, B), jnp.float32),
        grid=(num_tiles,),
        in_specs=[
            pl.BlockSpec((TB, F), lambda i: (i, 0)),               # streamed x tile
            # Constant index_map keeps the 88 KiB parameter slab VMEM-resident
            # (one DMA).  Default double-buffering of it only costs another
            # 88 KiB, so we keep the plain pipelined BlockSpec for robustness.
            pl.BlockSpec((_SLAB_ROWS, _LANES), lambda i: (0, 0)),
        ],
        out_specs=pl.BlockSpec((1, TB), lambda i: (0, i)),         # lane-dense output
        compiler_params=pltpu.CompilerParams(
            dimension_semantics=("parallel",),
        ),
    )(x, slab)
    # (1, B) -> (B, 1) is an order-preserving reshape (no transpose needed).
    return out.reshape(B, 1)


def init_params(key):
    """Deterministic init mimicking nn.Linear default (uniform +/- 1/sqrt(in))."""
    params = []
    for (fan_in, fan_out) in SIZES:
        key, kw, kb = jax.random.split(key, 3)
        bound = 1.0 / math.sqrt(fan_in)
        # stored as (in, out): equivalent to PyTorch W.T
        w = jax.random.uniform(kw, (fan_in, fan_out), jnp.float32, -bound, bound)
        b = jax.random.uniform(kb, (1, fan_out), jnp.float32, -bound, bound)
        params.append((w, b))
    return params


def reference_forward(x, params):
    h = x
    for i, (w, b) in enumerate(params):
        h = jnp.dot(h, w) + b
        if i < len(params) - 1:
            h = jnp.where(h > 0, h, NEG_SLOPE * h)
    return h


if __name__ == "__main__":
    key = jax.random.PRNGKey(0)
    key, kx_small, kx_big = jax.random.split(key, 3)
    params = init_params(key)
    slab = pack_params(params)

    # Small batch consistent with the module, plus a multi-tile ragged batch
    # exercising the grid, the bounded edge loads and masked edge stores.
    for B, kx in ((8, kx_small), (1000, kx_big)):
        x = jax.random.normal(kx, (B, 15), jnp.float32)
        out = jax.block_until_ready(improved_model_forward(x, slab))
        ref = reference_forward(x, params)
        assert out.shape == (B, 1), out.shape
        max_err = float(jnp.max(jnp.abs(out - ref)))
        assert jnp.allclose(out, ref, atol=1e-5, rtol=1e-5), max_err

    print("KERNEL_OK")
</pallas_src>

<mosaic_0001>
module attributes {stable_mosaic.version = 11 : i64} {
  func.func @mlp_kernel(%arg0: i32, %arg1: memref<256x15xf32, #tpu.memory_space<vmem>>, %arg2: memref<176x128xf32, #tpu.memory_space<vmem>>, %arg3: memref<1x256xf32, #tpu.memory_space<vmem>>) attributes {dimension_semantics = [#tpu.dimension_semantics<parallel>], iteration_bounds = array<i64: 1>, scalar_prefetch = 0 : i64, scratch_operands = 0 : i64, tpu.core_type = #tpu.core_type<tc>, window_params = [{transform_indices = @transform_0, window_bounds = array<i64: 256, 15>}, {pipeline_mode = #tpu.pipeline_mode<synchronous>, transform_indices = @transform_1, window_bounds = array<i64: 176, 128>}, {transform_indices = @transform_2, window_bounds = array<i64: 1, 256>}]} {
    %c0 = arith.constant 0 : index
    %c0_0 = arith.constant 0 : index
    %0 = vector.load %arg2[%c0, %c0_0] : memref<176x128xf32, #tpu.memory_space<vmem>>, vector<40x15xf32>
    %c88 = arith.constant 88 : index
    %c0_1 = arith.constant 0 : index
    %1 = vector.load %arg2[%c88, %c0_1] : memref<176x128xf32, #tpu.memory_space<vmem>>, vector<40x1xf32>
    %c0_2 = arith.constant 0 : index
    %c0_3 = arith.constant 0 : index
    %2 = vector.load %arg1[%c0_2, %c0_3] : memref<256x15xf32, #tpu.memory_space<vmem>>, vector<256x15xf32>
    %cst = arith.constant dense<0.000000e+00> : vector<40x256xf32>
    %3 = tpu.matmul %0, %2, %cst {dimension_numbers = #tpu.dot_dimension_numbers<[1], [1], [0], [0], [0, 0, 1, 0], [], []>} : vector<40x15xf32>, vector<256x15xf32>, vector<40x256xf32> -> vector<40x256xf32>
    %4 = vector.broadcast %1 : vector<40x1xf32> to vector<40x256xf32>
    %5 = arith.addf %3, %4 : vector<40x256xf32>
    %cst_4 = arith.constant 0.000000e+00 : f32
    %6 = vector.broadcast %cst_4 : f32 to vector<40x256xf32>
    %7 = arith.cmpf ogt, %5, %6 : vector<40x256xf32>
    %cst_5 = arith.constant 0.00999999977 : f32
    %8 = vector.broadcast %cst_5 : f32 to vector<40x256xf32>
    %9 = arith.mulf %8, %5 : vector<40x256xf32>
    %10 = arith.select %7, %5, %9 : vector<40x256xi1>, vector<40x256xf32>
    %c40 = arith.constant 40 : index
    %c0_6 = arith.constant 0 : index
    %11 = vector.load %arg2[%c40, %c0_6] : memref<176x128xf32, #tpu.memory_space<vmem>>, vector<8x40xf32>
    %c128 = arith.constant 128 : index
    %c0_7 = arith.constant 0 : index
    %12 = vector.load %arg2[%c128, %c0_7] : memref<176x128xf32, #tpu.memory_space<vmem>>, vector<8x1xf32>
    %cst_8 = arith.constant dense<0.000000e+00> : vector<8x256xf32>
    %13 = tpu.matmul %11, %10, %cst_8 {dimension_numbers = #tpu.dot_dimension_numbers<[1], [0], [0], [1], [0, 0, 1, 1], [], []>} : vector<8x40xf32>, vector<40x256xf32>, vector<8x256xf32> -> vector<8x256xf32>
    %14 = vector.broadcast %12 : vector<8x1xf32> to vector<8x256xf32>
    %15 = arith.addf %13, %14 : vector<8x256xf32>
    %cst_9 = arith.constant 0.000000e+00 : f32
    %16 = vector.broadcast %cst_9 : f32 to vector<8x256xf32>
    %17 = arith.cmpf ogt, %15, %16 : vector<8x256xf32>
    %cst_10 = arith.constant 0.00999999977 : f32
    %18 = vector.broadcast %cst_10 : f32 to vector<8x256xf32>
    %19 = arith.mulf %18, %15 : vector<8x256xf32>
    %20 = arith.select %17, %15, %19 : vector<8x256xi1>, vector<8x256xf32>
    %c48 = arith.constant 48 : index
    %c0_11 = arith.constant 0 : index
    %21 = vector.load %arg2[%c48, %c0_11] : memref<176x128xf32, #tpu.memory_space<vmem>>, vector<16x8xf32>
    %c136 = arith.constant 136 : index
    %c0_12 = arith.constant 0 : index
    %22 = vector.load %arg2[%c136, %c0_12] : memref<176x128xf32, #tpu.memory_space<vmem>>, vector<16x1xf32>
    %cst_13 = arith.constant dense<0.000000e+00> : vector<16x256xf32>
    %23 = tpu.matmul %21, %20, %cst_13 {dimension_numbers = #tpu.dot_dimension_numbers<[1], [0], [0], [1], [0, 0, 1, 1], [], []>} : vector<16x8xf32>, vector<8x256xf32>, vector<16x256xf32> -> vector<16x256xf32>
    %24 = vector.broadcast %22 : vector<16x1xf32> to vector<16x256xf32>
    %25 = arith.addf %23, %24 : vector<16x256xf32>
    %cst_14 = arith.constant 0.000000e+00 : f32
    %26 = vector.broadcast %cst_14 : f32 to vector<16x256xf32>
    %27 = arith.cmpf ogt, %25, %26 : vector<16x256xf32>
    %cst_15 = arith.constant 0.00999999977 : f32
    %28 = vector.broadcast %cst_15 : f32 to vector<16x256xf32>
    %29 = arith.mulf %28, %25 : vector<16x256xf32>
    %30 = arith.select %27, %25, %29 : vector<16x256xi1>, vector<16x256xf32>
    %c64 = arith.constant 64 : index
    %c0_16 = arith.constant 0 : index
    %31 = vector.load %arg2[%c64, %c0_16] : memref<176x128xf32, #tpu.memory_space<vmem>>, vector<8x16xf32>
    %c152 = arith.constant 152 : index
    %c0_17 = arith.constant 0 : index
    %32 = vector.load %arg2[%c152, %c0_17] : memref<176x128xf32, #tpu.memory_space<vmem>>, vector<8x1xf32>
    %cst_18 = arith.constant dense<0.000000e+00> : vector<8x256xf32>
    %33 = tpu.matmul %31, %30, %cst_18 {dimension_numbers = #tpu.dot_dimension_numbers<[1], [0], [0], [1], [0, 0, 1, 1], [], []>} : vector<8x16xf32>, vector<16x256xf32>, vector<8x256xf32> -> vector<8x256xf32>
    %34 = vector.broadcast %32 : vector<8x1xf32> to vector<8x256xf32>
    %35 = arith.addf %33, %34 : vector<8x256xf32>
    %cst_19 = arith.constant 0.000000e+00 : f32
    %36 = vector.broadcast %cst_19 : f32 to vector<8x256xf32>
    %37 = arith.cmpf ogt, %35, %36 : vector<8x256xf32>
    %cst_20 = arith.constant 0.00999999977 : f32
    %38 = vector.broadcast %cst_20 : f32 to vector<8x256xf32>
    %39 = arith.mulf %38, %35 : vector<8x256xf32>
    %40 = arith.select %37, %35, %39 : vector<8x256xi1>, vector<8x256xf32>
    %c72 = arith.constant 72 : index
    %c0_21 = arith.constant 0 : index
    %41 = vector.load %arg2[%c72, %c0_21] : memref<176x128xf32, #tpu.memory_space<vmem>>, vector<8x8xf32>
    %c160 = arith.constant 160 : index
    %c0_22 = arith.constant 0 : index
    %42 = vector.load %arg2[%c160, %c0_22] : memref<176x128xf32, #tpu.memory_space<vmem>>, vector<8x1xf32>
    %cst_23 = arith.constant dense<0.000000e+00> : vector<8x256xf32>
    %43 = tpu.matmul %41, %40, %cst_23 {dimension_numbers = #tpu.dot_dimension_numbers<[1], [0], [0], [1], [0, 0, 1, 1], [], []>} : vector<8x8xf32>, vector<8x256xf32>, vector<8x256xf32> -> vector<8x256xf32>
    %44 = vector.broadcast %42 : vector<8x1xf32> to vector<8x256xf32>
    %45 = arith.addf %43, %44 : vector<8x256xf32>
    %cst_24 = arith.constant 0.000000e+00 : f32
    %46 = vector.broadcast %cst_24 : f32 to vector<8x256xf32>
    %47 = arith.cmpf ogt, %45, %46 : vector<8x256xf32>
    %cst_25 = arith.constant 0.00999999977 : f32
    %48 = vector.broadcast %cst_25 : f32 to vector<8x256xf32>
    %49 = arith.mulf %48, %45 : vector<8x256xf32>
    %50 = arith.select %47, %45, %49 : vector<8x256xi1>, vector<8x256xf32>
    %c80 = arith.constant 80 : index
    %c0_26 = arith.constant 0 : index
    %51 = vector.load %arg2[%c80, %c0_26] : memref<176x128xf32, #tpu.memory_space<vmem>>, vector<8x8xf32>
    %c168 = arith.constant 168 : index
    %c0_27 = arith.constant 0 : index
    %52 = vector.load %arg2[%c168, %c0_27] : memref<176x128xf32, #tpu.memory_space<vmem>>, vector<1x1xf32>
    %cst_28 = arith.constant dense<0.000000e+00> : vector<8x256xf32>
    %53 = tpu.matmul %51, %50, %cst_28 {dimension_numbers = #tpu.dot_dimension_numbers<[1], [0], [0], [1], [0, 0, 1, 1], [], []>} : vector<8x8xf32>, vector<8x256xf32>, vector<8x256xf32> -> vector<8x256xf32>
    %54 = vector.extract_strided_slice %53 {offsets = [0, 0], sizes = [1, 256], strides = [1, 1]} : vector<8x256xf32> to vector<1x256xf32>
    %55 = vector.broadcast %52 : vector<1x1xf32> to vector<1x256xf32>
    %56 = arith.addf %54, %55 : vector<1x256xf32>
    %c0_29 = arith.constant 0 : index
    %c0_30 = arith.constant 0 : index
    %57 = vector.load %arg3[%c0_29, %c0_30] : memref<1x256xf32, #tpu.memory_space<vmem>>, vector<1x256xf32>
    tpu.vector_store %arg3[%c0_29, %c0_30], %56 {strides = array<i32>} : memref<1x256xf32, #tpu.memory_space<vmem>>, vector<1x256xf32>,
    return
  }
  func.func @transform_0(%arg0: i32) -> (i32, i32) {
    %c0_i32 = arith.constant 0 : i32
    %c0_i32_0 = arith.constant 0 : i32
    return %arg0, %c0_i32 : i32, i32
  }
  func.func @transform_1(%arg0: i32) -> (i32, i32) {
    %c0_i32 = arith.constant 0 : i32
    %c0_i32_0 = arith.constant 0 : i32
    %c0_i32_1 = arith.constant 0 : i32
    return %c0_i32, %c0_i32_0 : i32, i32
  }
  func.func @transform_2(%arg0: i32) -> (i32, i32) {
    %c0_i32 = arith.constant 0 : i32
    %c0_i32_0 = arith.constant 0 : i32
    return %c0_i32, %arg0 : i32, i32
  }
}

</mosaic_0001>

<bundles_post_ra>
// kernel: tpu_custom_call.1
= control target key start
LH: loop header
LB: loop body
LE: loop exit
PB: predicated region body
PF: predicated region fallthrough
CT: control target
= control target key end

     0   :  { %7 = vsyncpa [#allocation3], 0  ;;  %s1187_s0 = inlined_call_operand.hbm [shape: f32[8,15], index: 0, kind: input, shape index: {}]   ;;  %s1188_s1 = inlined_call_operand.hbm [shape: f32[176,128], index: 1, kind: input, shape index: {}]   ;;  %s1189_s2 = inlined_call_operand.hbm [shape: f32[1,8], index: 2, kind: output, shape index: {}]  }
   0x1   :  { %8 = vsyncpa [#allocation6], 0 }
   0x2   :  { %9 = vsyncpa [#allocation4], 0 }
   0x3   :  { %14 = vsyncadd [#allocation3], 3968  ;;  %s1066_s9 = smov [#allocation2]   ;;  %s994_s13 = scalar_lea.hbm %s1187_s0, 128 }
   0x4   :  { %s15_s10 = sshll.u32 %s1066_s9, 4  ;;  %p995_p0 = scmp.ne.s32.totalorder %s1187_s0, %s994_s13  ;;  %s16_s10 = int_to_ptr.vmem [resolvable:$true] %s15_s10 }
   0x5   :  { %p998_p1 = scmp.lt.u32.totalorder %s994_s13, %s1187_s0 }
   0x7   :  { %p1000_p2 = pnand %p998_p1, %p995_p0 }
   0x9   :  { %1003 = shalt.err (!%p1000_p2)
}
   0xa   :  { %s1004_s18 = scalar_lea.vmem %s16_s10, 128  ;;  %s1008_s19 = scalar_lea.vmem %s16_s10, 4096 }
   0xb   :  { %p1005_p3 = scmp.ne.s32.totalorder %s16_s10, %s1004_s18  ;;  %p1009_p4 = scmp.lt.s32.totalorder %s16_s10, %s16_s10 }
   0xc   :  { %p1010_p5 = scmp.lt.s32.totalorder %s1008_s19, %s1004_s18 }
   0xe   :  { %p1011_p6 = por %p1010_p5, %p1009_p4 }
  0x10   :  { %p1012_p7 = pnand %p1011_p6, %p1005_p3 }
  0x12   :  { %1015 = shalt.err (!%p1012_p7)
}
  0x13   :  { %s1067_s20 = smov 128   ;;  %s1068_s21 = smov 8  }
  0x14   :  { %21 = dma.hbm_to_vmem [thread:$0]  %s1187_s0, 128, %s16_s10, [#allocation3], %s1067_s20, %s1067_s20, %s1068_s21  }
  0x15   :  { %s1069_s24 = smov [#allocation5]   ;;  %s1016_s28 = scalar_lea.hbm %s1188_s1, 2816 }
  0x16   :  { %s27_s25 = sshll.u32 %s1069_s24, 4  ;;  %p1017_p8 = scmp.ne.s32.totalorder %s1188_s1, %s1016_s28  ;;  %s28_s25 = int_to_ptr.vmem [resolvable:$true] %s27_s25 }
  0x17   :  { %p1020_p9 = scmp.lt.u32.totalorder %s1016_s28, %s1188_s1 }
  0x19   :  { %p1022_p10 = pnand %p1020_p9, %p1017_p8 }
  0x1b   :  { %1025 = shalt.err (!%p1022_p10)
}
  0x1c   :  { %s1026_s5 = scalar_lea.vmem %s28_s25, 2816  ;;  %p1031_p12 = scmp.lt.s32.totalorder %s28_s25, %s28_s25 }
  0x1d   :  { %p1027_p11 = scmp.ne.s32.totalorder %s28_s25, %s1026_s5  ;;  %p1032_p13 = scmp.lt.s32.totalorder %s1026_s5, %s1026_s5 }
  0x1f   :  { %p1033_p0 = por %p1032_p13, %p1031_p12 }
  0x21   :  { %p1034_p1 = pnand %p1033_p0, %p1027_p11 }
  0x23   :  { %1037 = shalt.err (!%p1034_p1)
}
  0x24   :  { %33 = dma.hbm_to_vmem [thread:$0]  %s1188_s1, 2816, %s28_s25, [#allocation6], %s1067_s20, %s1067_s20, %s1068_s21  }
  0x25   :  { %1060 = dma.done.wait [#allocation3], 4096  }
  0x26   :  { %1061 = vsyncadd [#allocation3], 4294963200 }
  0x27   :  { %1062 = dma.done.wait [#allocation6], 2816  }
  0x28   :  { %1063 = vsyncadd [#allocation6], 4294964480  ;;  %v1070_v0 = vmov 0   ;;  %vm107_vm0 = vcmask 121856   ;;  %v66_v2 = vld [vmem:[#allocation2 + $0x80] sm:$0xff]  ;;  %v67_v3 = vld [vmem:[#allocation2 + $0x88] sm:$0xff] }
  0x29   :  { %992 = vset.pattern.permute.xlu0 %v1070_v0  ;;  %993 = vset.pattern.permute.xlu1 %v1070_v0  ;;  %vm1115_vm1 = vmpackc.low %vm107_vm0, %vm107_vm0  ;;  %v50_v4 = vld [vmem:[#allocation2] sm:$0xff]  ;;  %v924_v5 = vpack.c.bf16 %v67_v3, %v66_v2  ;;  %v51_v6 = vld [vmem:[#allocation2 + $0x8] sm:$0xff]  ;;  %v1071_v1 = vmov 0.0   ;;  %vm351_vm12 = vcmask 326656   ;;  %vm446_vm15 = vcmask 64512  }
  0x2a   :  { %v68_v7 = vld [vmem:[#allocation2 + $0x90] sm:$0xff]  ;;  %v69_v8 = vld [vmem:[#allocation2 + $0x98] sm:$0xff]  ;;  %v927_v9 = vpack.c.bf16 %v51_v6, %v50_v4  ;;  %v70_v13 = vld [vmem:[#allocation2 + $0xa0] sm:$0xff]  ;;  %419 = vmatprep.mubr.f32.mxu1 %v1071_v1 }
  0x2b   :  { %v930_v10 = vpack.c.bf16 %v69_v8, %v68_v7  ;;  %926 = vmatprep.subr.msk.bf16.mxu0 %vm1115_vm1, %v924_v5  ;;  %v52_v11 = vld [vmem:[#allocation2 + $0x10] sm:$0xff]  ;;  %v53_v12 = vld [vmem:[#allocation2 + $0x18] sm:$0xff]  ;;  %v71_v14 = vld [vmem:[#allocation2 + $0xa8] sm:$0xff] }
  0x2c   :  { %929 = vmatpush3.bf16.xpose.msk.msra.mxu0 %vm1115_vm1, %v927_v9  ;;  %v933_v15 = vpack.c.bf16 %v53_v12, %v52_v11  ;;  %v936_v16 = vpack.c.bf16 %v71_v14, %v70_v13  ;;  %v1125_v17 = vld [vmem:[#allocation5] sm:$0xff]  ;;  %v45_v18 = vld [vmem:[#allocation5 + $0x58] sm:$0xff]  ;;  %v55_v20 = vld [vmem:[#allocation2 + $0x28] sm:$0xff] }
  0x2d   :  { %932 = vmatprep.subr.msk.bf16.mxu0 %vm1115_vm1, %v930_v10  ;;  %914 = vmatprep.mubr.msk.f32.mxu0 %vm107_vm0, %v1125_v17  ;;  %v54_v19 = vld [vmem:[#allocation2 + $0x20] sm:$0xff]  ;;  %v47_v21 = vld [vmem:[#allocation5 + $0x68] sm:$0xff]  ;;  %v72_v22 = vld [vmem:[#allocation2 + $0xb0] sm:$0xff] }
  0x2e   :  { %84 = vperm.xlu0 %992, %v45_v18   ;;  %v73_v23 = vld [vmem:[#allocation2 + $0xb8] sm:$0xff]  ;;  %v46_v24 = vld [vmem:[#allocation5 + $0x60] sm:$0xff]  ;;  %94 = vperm.xlu1 %993, %v47_v21   ;;  %v48_v25 = vld [vmem:[#allocation5 + $0x70] sm:$0xff]  ;;  %v939_v26 = vpack.c.bf16 %v55_v20, %v54_v19 }
  0x2f   :  { %v942_v27 = vpack.c.bf16 %v73_v23, %v72_v22  ;;  %v49_v28 = vld [vmem:[#allocation5 + $0x78] sm:$0xff]  ;;  %v345_v29 = vld [vmem:[#allocation5 + $0x80] sm:$0xff]  ;;  %v56_v30 = vld [vmem:[#allocation2 + $0x30] sm:$0xff] }
  0x30   :  { %v57_v31 = vld [vmem:[#allocation2 + $0x38] sm:$0xff]  ;;  %v74_v32 = vld [vmem:[#allocation2 + $0xc0] sm:$0xff]  ;;  %v75_v33 = vld [vmem:[#allocation2 + $0xc8] sm:$0xff] }
  0x31   :  { %v434_v34 = vld [vmem:[#allocation5 + $0x88] sm:$0xff]  ;;  %v435_v35 = vld [vmem:[#allocation5 + $0x90] sm:$0xff]  ;;  %v945_v36 = vpack.c.bf16 %v57_v31, %v56_v30  ;;  %v948_v37 = vpack.c.bf16 %v75_v33, %v74_v32  ;;  %v543_v38 = vld [vmem:[#allocation5 + $0x98] sm:$0xff] }
  0x32   :  { %89 = vperm.xlu0 %992, %v46_v24   ;;  %99 = vperm.xlu1 %993, %v48_v25   ;;  %v631_v39 = vld [vmem:[#allocation5 + $0xa0] sm:$0xff]  ;;  %v59_v41 = vld [vmem:[#allocation2 + $0x48] sm:$0xff]  ;;  %v76_v42 = vld [vmem:[#allocation2 + $0xd0] sm:$0xff] }
  0x33   :  { %v58_v40 = vld [vmem:[#allocation2 + $0x40] sm:$0xff]  ;;  %v77_v43 = vld [vmem:[#allocation2 + $0xd8] sm:$0xff]  ;;  %v718_v44 = vld [vmem:[#allocation5 + $0xa8] sm:$0x1] }
  0x34   :  { %935 = vmatpush3.bf16.xpose.msk.msra.mxu0 %vm1115_vm1, %v933_v15  ;;  %v951_v45 = vpack.c.bf16 %v59_v41, %v58_v40  ;;  %v954_v46 = vpack.c.bf16 %v77_v43, %v76_v42  ;;  %v60_v47 = vld [vmem:[#allocation2 + $0x50] sm:$0xff]  ;;  %v61_v48 = vld [vmem:[#allocation2 + $0x58] sm:$0xff]  ;;  %v78_v49 = vld [vmem:[#allocation2 + $0xe0] sm:$0xff] }
  0x35   :  { %938 = vmatprep.subr.msk.bf16.mxu0 %vm1115_vm1, %v936_v16  ;;  %v79_v50 = vld [vmem:[#allocation2 + $0xe8] sm:$0xff]  ;;  %v957_v51 = vpack.c.bf16 %v61_v48, %v60_v47  ;;  %v62_v53 = vld [vmem:[#allocation2 + $0x60] sm:$0xff]  ;;  %v80_v55 = vld [vmem:[#allocation2 + $0xf0] sm:$0xff] }
  0x36   :  { %104 = vperm.xlu0 %992, %v49_v28   ;;  %348 = vperm.xlu1 %993, %v345_v29   ;;  %v960_v52 = vpack.c.bf16 %v79_v50, %v78_v49  ;;  %v63_v54 = vld [vmem:[#allocation2 + $0x68] sm:$0xff]  ;;  %v81_v56 = vld [vmem:[#allocation2 + $0xf8] sm:$0xff]  ;;  %v64_v59 = vld [vmem:[#allocation2 + $0x70] sm:$0xff] }
  0x37   :  { %v963_v57 = vpack.c.bf16 %v63_v54, %v62_v53  ;;  %v966_v58 = vpack.c.bf16 %v81_v56, %v80_v55  ;;  %v65_v60 = vld [vmem:[#allocation2 + $0x78] sm:$0xff]  ;;  %v41_v62 = vld [vmem:[#allocation5 + $0x8] sm:$0xff]  ;;  %v42_v63 = vld [vmem:[#allocation5 + $0x10] sm:$0xff] }
  0x38   :  { %v969_v61 = vpack.c.bf16 %v65_v60, %v64_v59  ;;  %v43_v0 = vld [vmem:[#allocation5 + $0x18] sm:$0xff]  ;;  %v44_v2 = vld [vmem:[#allocation5 + $0x20] sm:$0xff] }
  0x3a   :  { %438 = vperm.xlu0 %992, %v434_v34   ;;  %443 = vperm.xlu1 %993, %v435_v35  }
  0x3c   :  { %941 = vmatpush3.bf16.xpose.msk.msra.mxu0 %vm1115_vm1, %v939_v26 }
  0x3d   :  { %944 = vmatprep.subr.msk.bf16.mxu0 %vm1115_vm1, %v942_v27 }
  0x3e   :  { %546 = vperm.xlu0 %992, %v543_v38   ;;  %634 = vperm.xlu1 %993, %v631_v39  }
  0x42   :  { %795 = vperm.xlu0 %992, %v718_v44  }
  0x44   :  { %947 = vmatpush3.bf16.xpose.msk.msra.mxu0 %vm1115_vm1, %v945_v36 }
  0x45   :  { %950 = vmatprep.subr.msk.bf16.mxu0 %vm1115_vm1, %v948_v37 }
  0x4c   :  { %953 = vmatpush3.bf16.xpose.msk.msra.mxu0 %vm1115_vm1, %v951_v45 }
  0x4d   :  { %956 = vmatprep.subr.msk.bf16.mxu0 %vm1115_vm1, %v954_v46 }
  0x54   :  { %959 = vmatpush3.bf16.xpose.msk.msra.mxu0 %vm1115_vm1, %v957_v51  ;;  %v344_v51 = vld [vmem:[#allocation5 + $0x28] sm:$0xff] }
  0x55   :  { %962 = vmatprep.subr.msk.bf16.mxu0 %vm1115_vm1, %v960_v52 }
  0x5c   :  { %965 = vmatpush3.bf16.xpose.msk.msra.mxu0 %vm1115_vm1, %v963_v57 }
  0x5d   :  { %968 = vmatprep.subr.msk.bf16.mxu0 %vm1115_vm1, %v966_v58 }
  0x64   :  { %971 = vmatpush3.bf16.xpose.msk.msra.mxu0 %vm1115_vm1, %v969_v61  ;;  %v432_v61 = vld [vmem:[#allocation5 + $0x30] sm:$0xff] }
  0x6b   :  { %915 = vmatmul.mubr.msk.f32.vlgmr.msra.gmra.mrb[0].mxu0 %vm107_vm0, %v1125_v17 }
  0x6c   :  { %916 = vmatprep.mubr.msk.f32.mxu0 %vm107_vm0, %v41_v62 }
  0x6f   :  { %917 = vmatmul.mubr.msk.f32.gmra.mrb[2].mxu0 %vm107_vm0, %v41_v62 }
  0x70   :  { %918 = vmatprep.mubr.msk.f32.mxu0 %vm107_vm0, %v42_v63 }
  0x73   :  { %919 = vmatmul.mubr.msk.f32.gmra.mrb[4].mxu0 %vm107_vm0, %v42_v63  ;;  %v433_v63 = vld [vmem:[#allocation5 + $0x38] sm:$0xff] }
  0x74   :  { %920 = vmatprep.mubr.msk.f32.mxu0 %vm107_vm0, %v43_v0 }
  0x77   :  { %921 = vmatmul.mubr.msk.f32.gmra.mrb[6].mxu0 %vm107_vm0, %v43_v0 }
  0x78   :  { %922 = vmatprep.mubr.msk.f32.mxu0 %vm107_vm0, %v44_v2 }
  0x7b   :  { %923 = vmatmul.mubr.msk.f32.gmra.mrb[8].mxu0 %vm107_vm0, %v44_v2 }
  0xad   :  { %v85_v3 = vpop.permute.xlu0 %84  ;;  %v95_v13 = vpop.permute.xlu1 %94 }
  0xb1   :  { %v90_v8 = vpop.permute.xlu0 %89  ;;  %v100_v28 = vpop.permute.xlu1 %99 }
  0xb5   :  { %v105_v36 = vpop.permute.xlu0 %104  ;;  %v349_v53 = vpop.permute.xlu1 %348 }
  0xb9   :  { %v439_v0 = vpop.permute.xlu0 %438 }
 0x13e   :  { %v285_v4 = vpop.f32.mrb[0].mxu0 }
 0x13f   :  { %v286_v5 = vadd.f32 %v285_v4, %v85_v3  ;;  %v287_v6 = vpop.f32.mrb[1].mxu0 }
 0x140   :  { %v288_v7 = vadd.f32 %v287_v6, %v85_v3  ;;  %v444_v6 = vpop.permute.xlu1 %443 }
 0x141   :  { %v324_v10 = vmul.f32 0.01, %v286_v5  ;;  %vm314_vm2 = vcmp.gt.f32.partialorder %v286_v5, 0.0 }
 0x142   :  { %v291_v9 = vpop.f32.mrb[2].mxu0  ;;  %v325_v14 = vmul.f32 0.01, %v288_v7  ;;  %vm315_vm3 = vcmp.gt.f32.partialorder %v288_v7, 0.0 }
 0x143   :  { %v292_v11 = vadd.f32 %v291_v9, %v90_v8  ;;  %v293_v12 = vpop.f32.mrb[3].mxu0  ;;  %v334_v21 = vsel %vm314_vm2, %v286_v5, %v324_v10 }
 0x144   :  { %v294_v15 = vadd.f32 %v293_v12, %v90_v8  ;;  %v335_v24 = vsel %vm315_vm3, %v288_v7, %v325_v14 }
 0x145   :  { %v326_v16 = vmul.f32 0.01, %v292_v11  ;;  %vm316_vm4 = vcmp.gt.f32.partialorder %v292_v11, 0.0 }
 0x146   :  { %v327_v17 = vmul.f32 0.01, %v294_v15  ;;  %v297_v18 = vpop.f32.mrb[4].mxu0  ;;  %vm317_vm5 = vcmp.gt.f32.partialorder %v294_v15, 0.0 }
 0x147   :  { %v298_v19 = vadd.f32 %v297_v18, %v95_v13  ;;  %v299_v20 = vpop.f32.mrb[5].mxu0  ;;  %v336_v22 = vsel %vm316_vm4, %v292_v11, %v326_v16  ;;  %vm549_vm4 = vcmask 130048  }
 0x148   :  { %v300_v23 = vadd.f32 %v299_v20, %v95_v13  ;;  %v337_v25 = vsel %vm317_vm5, %v294_v15, %v327_v17  ;;  %v974_v26 = vpack.c.bf16 %v336_v22, %v334_v21  ;;  %v542_v21 = vld [vmem:[#allocation5 + $0x40] sm:$0xff]  ;;  %v547_v22 = vpop.permute.xlu0 %546 }
 0x149   :  { %v972_v27 = vpack.c.bf16 %v337_v25, %v335_v24  ;;  %v328_v30 = vmul.f32 0.01, %v298_v19  ;;  %vm318_vm6 = vcmp.gt.f32.partialorder %v298_v19, 0.0 }
 0x14a   :  { %v303_v29 = vpop.f32.mrb[6].mxu0  ;;  %v329_v33 = vmul.f32 0.01, %v300_v23  ;;  %vm319_vm7 = vcmp.gt.f32.partialorder %v300_v23, 0.0 }
 0x14b   :  { %v304_v31 = vadd.f32 %v303_v29, %v100_v28  ;;  %v305_v32 = vpop.f32.mrb[7].mxu0  ;;  %973 = vmatprep.subr.bf16.mxu1 %v972_v27  ;;  %v338_v41 = vsel %vm318_vm6, %v298_v19, %v328_v30  ;;  %v630_v30 = vld [vmem:[#allocation5 + $0x48] sm:$0xff] }
 0x14c   :  { %v306_v34 = vadd.f32 %v305_v32, %v100_v28  ;;  %975 = vmatpush1.bf16.msra.mxu1 %v974_v26  ;;  %v339_v44 = vsel %vm319_vm7, %v300_v23, %v329_v33  ;;  %v635_v32 = vpop.permute.xlu1 %634 }
 0x14d   :  { %vm320_vm8 = vcmp.gt.f32.partialorder %v304_v31, 0.0  ;;  %v330_v35 = vmul.f32 0.01, %v304_v31 }
 0x14e   :  { %vm321_vm9 = vcmp.gt.f32.partialorder %v306_v34, 0.0  ;;  %v331_v37 = vmul.f32 0.01, %v306_v34  ;;  %v309_v38 = vpop.f32.mrb[8].mxu0 }
 0x14f   :  { %v310_v39 = vadd.f32 %v309_v38, %v105_v36  ;;  %v311_v40 = vpop.f32.mrb[9].mxu0  ;;  %v340_v42 = vsel %vm320_vm8, %v304_v31, %v330_v35 }
 0x150   :  { %v312_v43 = vadd.f32 %v311_v40, %v105_v36  ;;  %v341_v45 = vsel %vm321_vm9, %v306_v34, %v331_v37  ;;  %v978_v46 = vpack.c.bf16 %v340_v42, %v338_v41  ;;  %v717_v40 = vld [vmem:[#allocation5 + $0x50] sm:$0xff]  ;;  %v1072_v42 = vmov 1966171168  }
 0x151   :  { %v976_v47 = vpack.c.bf16 %v341_v45, %v339_v44  ;;  %v332_v49 = vmul.f32 0.01, %v310_v39  ;;  %vm322_vm11 = vcmp.gt.f32.partialorder %v310_v39, 0.0  ;;  %v806_v44 = vlaneseq }
 0x152   :  { %v333_v48 = vmul.f32 0.01, %v312_v43  ;;  %vm323_vm10 = vcmp.gt.f32.partialorder %v312_v43, 0.0 }
 0x153   :  { %977 = vmatprep.subr.bf16.mxu1 %v976_v47  ;;  %v342_v52 = vsel %vm322_vm11, %v310_v39, %v332_v49  ;;  %v807_v45 = vshrl.u32 %v806_v44, 7  ;;  %vm820_vm9 = vcmp.lt.s32.totalorder %v806_v44, 256 }
 0x154   :  { %979 = vmatpush1.bf16.msra.mxu1 %v978_v46  ;;  %v343_v50 = vsel %vm323_vm10, %v312_v43, %v333_v48  ;;  %v804_v43 = vunpack.c.l.s4 %v1072_v42  ;;  %v796_v46 = vpop.permute.xlu0 %795 }
 0x155   :  { %363 = vmatprep.subr.mxu1 %v343_v50 }
 0x158   :  { %364 = vmatpush1.msra.mxu1 %v342_v52 }
 0x159   :  { %876 = vmatmul.mubr.msk.f32.vlgmr.msra.gmra.mrb[0].mxu1 %vm351_vm12, %v344_v51 }
 0x15a   :  { %517 = vmatprep.mubr.f32.mxu1 %v1071_v1 }
 0x22c   :  { %v421_v54 = vpop.f32.mrb[0].mxu1 }
 0x22d   :  { %v422_v55 = vadd.f32 %v421_v54, %v349_v53  ;;  %v423_v56 = vpop.f32.mrb[1].mxu1 }
 0x22e   :  { %v424_v57 = vadd.f32 %v423_v56, %v349_v53 }
 0x22f   :  { %v428_v58 = vmul.f32 0.01, %v422_v55  ;;  %vm426_vm13 = vcmp.gt.f32.partialorder %v422_v55, 0.0 }
 0x230   :  { %v429_v59 = vmul.f32 0.01, %v424_v57  ;;  %vm427_vm14 = vcmp.gt.f32.partialorder %v424_v57, 0.0 }
 0x231   :  { %v430_v62 = vsel %vm426_vm13, %v422_v55, %v428_v58 }
 0x232   :  { %v431_v60 = vsel %vm427_vm14, %v424_v57, %v429_v59 }
 0x233   :  { %453 = vmatprep.subr.mxu1 %v431_v60 }
 0x234   :  { %454 = vmatpush1.msra.mxu1 %v430_v62 }
 0x235   :  { %877 = vmatmul.mubr.msk.f32.vlgmr.msra.gmra.mrb[2].mxu1 %vm446_vm15, %v432_v61 }
 0x236   :  { %523 = vmatprep.mubr.f32.mxu1 %v1071_v1 }
 0x239   :  { %878 = vmatmul.mubr.msk.f32.gmra.mrb[4].mxu1 %vm446_vm15, %v433_v63 }
 0x23a   :  { %617 = vmatprep.mubr.f32.mxu1 %v1071_v1 }
 0x308   :  { %v519_v2 = vpop.f32.mrb[2].mxu1 }
 0x309   :  { %v520_v3 = vadd.f32 %v519_v2, %v439_v0  ;;  %v521_v4 = vpop.f32.mrb[3].mxu1 }
 0x30a   :  { %v522_v5 = vadd.f32 %v521_v4, %v439_v0 }
 0x30b   :  { %v534_v8 = vmul.f32 0.01, %v520_v3  ;;  %vm530_vm0 = vcmp.gt.f32.partialorder %v520_v3, 0.0 }
 0x30c   :  { %v525_v7 = vpop.f32.mrb[4].mxu1  ;;  %v535_v11 = vmul.f32 0.01, %v522_v5  ;;  %vm531_vm1 = vcmp.gt.f32.partialorder %v522_v5, 0.0 }
 0x30d   :  { %v526_v9 = vadd.f32 %v525_v7, %v444_v6  ;;  %v527_v10 = vpop.f32.mrb[5].mxu1  ;;  %v538_v15 = vsel %vm530_vm0, %v520_v3, %v534_v8 }
 0x30e   :  { %v528_v12 = vadd.f32 %v527_v10, %v444_v6  ;;  %v539_v18 = vsel %vm531_vm1, %v522_v5, %v535_v11 }
 0x30f   :  { %vm532_vm2 = vcmp.gt.f32.partialorder %v526_v9, 0.0  ;;  %v536_v13 = vmul.f32 0.01, %v526_v9 }
 0x310   :  { %vm533_vm3 = vcmp.gt.f32.partialorder %v528_v12, 0.0  ;;  %v537_v14 = vmul.f32 0.01, %v528_v12 }
 0x311   :  { %v540_v16 = vsel %vm532_vm2, %v526_v9, %v536_v13 }
 0x312   :  { %v982_v17 = vpack.c.bf16 %v540_v16, %v538_v15  ;;  %v541_v19 = vsel %vm533_vm3, %v528_v12, %v537_v14 }
 0x313   :  { %v980_v20 = vpack.c.bf16 %v541_v19, %v539_v18 }
 0x315   :  { %981 = vmatprep.subr.bf16.mxu1 %v980_v20 }
 0x316   :  { %983 = vmatpush1.bf16.msra.mxu1 %v982_v17 }
 0x319   :  { %879 = vmatmul.mubr.msk.f32.vlgmr.msra.gmra.mrb[6].mxu1 %vm549_vm4, %v542_v21 }
 0x31a   :  { %704 = vmatprep.mubr.f32.mxu1 %v1071_v1 }
 0x3ec   :  { %v619_v23 = vpop.f32.mrb[6].mxu1 }
 0x3ed   :  { %v620_v24 = vadd.f32 %v619_v23, %v547_v22  ;;  %v621_v25 = vpop.f32.mrb[7].mxu1 }
 0x3ee   :  { %v622_v26 = vadd.f32 %v621_v25, %v547_v22 }
 0x3ef   :  { %v626_v27 = vmul.f32 0.01, %v620_v24  ;;  %vm624_vm5 = vcmp.gt.f32.partialorder %v620_v24, 0.0 }
 0x3f0   :  { %v627_v28 = vmul.f32 0.01, %v622_v26  ;;  %vm625_vm6 = vcmp.gt.f32.partialorder %v622_v26, 0.0 }
 0x3f1   :  { %v628_v31 = vsel %vm624_vm5, %v620_v24, %v626_v27 }
 0x3f2   :  { %v629_v29 = vsel %vm625_vm6, %v622_v26, %v627_v28 }
 0x3f3   :  { %640 = vmatprep.subr.mxu1 %v629_v29 }
 0x3f4   :  { %641 = vmatpush1.msra.mxu1 %v628_v31 }
 0x3f5   :  { %880 = vmatmul.mubr.msk.f32.vlgmr.msra.gmra.mrb[8].mxu1 %vm446_vm15, %v630_v30 }
 0x3f6   :  { %786 = vmatprep.mubr.f32.mxu1 %v1071_v1  ;;  %v805_v1 = vunpack.c.0.s8 %v804_v43 }
 0x3f8   :  { %v808_v51 = vsub.s32 %v805_v1, %v807_v45 }
 0x4c8   :  { %v706_v33 = vpop.f32.mrb[8].mxu1 }
 0x4c9   :  { %v707_v34 = vadd.f32 %v706_v33, %v635_v32  ;;  %v708_v35 = vpop.f32.mrb[9].mxu1 }
 0x4ca   :  { %v709_v36 = vadd.f32 %v708_v35, %v635_v32 }
 0x4cb   :  { %v713_v37 = vmul.f32 0.01, %v707_v34  ;;  %vm711_vm7 = vcmp.gt.f32.partialorder %v707_v34, 0.0 }
 0x4cc   :  { %v714_v38 = vmul.f32 0.01, %v709_v36  ;;  %vm712_vm8 = vcmp.gt.f32.partialorder %v709_v36, 0.0 }
 0x4cd   :  { %v715_v41 = vsel %vm711_vm7, %v707_v34, %v713_v37 }
 0x4ce   :  { %v716_v39 = vsel %vm712_vm8, %v709_v36, %v714_v38 }
 0x4cf   :  { %722 = vmatprep.subr.mxu1 %v716_v39 }
 0x4d0   :  { %723 = vmatpush1.msra.mxu1 %v715_v41 }
 0x4d1   :  { %881 = vmatmul.mubr.msk.f32.vlgmr.msra.gmra.mrb[10].mxu1 %vm446_vm15, %v717_v40 }
 0x5a4   :  { %v788_v47 = vpop.f32.mrb[10].mxu1 }
 0x5a5   :  { %v798_v48 = vadd.f32 %v796_v46, %v788_v47  ;;  %v790_v49 = vpop.f32.mrb[11].mxu1 }
 0x5a6   :  { %v799_v50 = vadd.f32 %v796_v46, %v790_v49 }
 0x5a8   :  { %v802_v52 = vcombine.low %v798_v48, %v799_v50 }
 0x5aa   :  { %v809_v53 = vrot.slane %v802_v52, %v808_v51 }
 0x5ac   :  { %v816_v54 = vrot.slane %v809_v53, %v808_v51 }
 0x5ae   :  { %822 = vst.msk [vmem:[#allocation7] sm:$0x3] %vm820_vm9, %v816_v54 }
 0x5af   :  { %827 = vsyncadd [#allocation4], 16  ;;  %s1073_s1 = smov [#allocation7]  }
 0x5b0   :  { %s829_s7 = sshll.u32 %s1073_s1, 4  ;;  %s830_s7 = int_to_ptr.vmem [resolvable:$true] %s829_s7 }
 0x5b1   :  { %s1038_s8 = scalar_lea.vmem %s830_s7, 16  ;;  %s1042_s9 = scalar_lea.vmem %s830_s7, 32 }
 0x5b2   :  { %p1039_p2 = scmp.ne.s32.totalorder %s830_s7, %s1038_s8  ;;  %p1043_p3 = scmp.lt.s32.totalorder %s830_s7, %s830_s7 }
 0x5b3   :  { %p1044_p4 = scmp.lt.s32.totalorder %s1042_s9, %s1038_s8 }
 0x5b5   :  { %p1045_p5 = por %p1044_p4, %p1043_p3 }
 0x5b7   :  { %p1046_p6 = pnand %p1045_p5, %p1039_p2 }
 0x5b9   :  { %1049 = shalt.err (!%p1046_p6)
}
 0x5ba   :  { %s1050_s12 = scalar_lea.hbm %s1189_s2, 16 }
 0x5bb   :  { %p1051_p7 = scmp.ne.s32.totalorder %s1189_s2, %s1050_s12  ;;  %p1054_p8 = scmp.lt.u32.totalorder %s1050_s12, %s1189_s2 }
 0x5bd   :  { %p1056_p9 = pnand %p1054_p8, %p1051_p7 }
 0x5bf   :  { %1059 = shalt.err (!%p1056_p9)
}
 0x5c0   :  { %832 = dma.vmem_to_hbm [thread:$0]  %s830_s7, 16, %s1189_s2, [#allocation4]  }
 0x5c1   :  { %1064 = dma.done.wait [#allocation4], 32  }
 0x5c2   :  { %1065 = vsyncadd [#allocation4], 4294967264 }
 0x5c3   :  { %836 = vsyncpa [#allocation3], 1 }
 0x5c4   :  { %837 = vsyncpa [#allocation6], 1 }
 0x5c5   :  { %838 = vsyncpa [#allocation4], 1 }

</bundles_post_ra>
